<compile_context>
chip_gen: v7x
topology: tpu7x:2x2x1
jax: 0.10.0
libtpu: 0.0.40
codegen_flags: <defaults>
</compile_context>

<pallas_src>
import jax
import jax.numpy as jnp
import numpy as np
from jax.experimental import pallas as pl
from jax.experimental.pallas import tpu as pltpu


def _attention_kernel(hidden_ref, enc_ref, wh_ref, we_ref, b_ref, v_ref,
                      mask_ref, out_ref):
    # Per grid step (one batch element):
    #   hidden_ref : (1, 1, H)
    #   enc_ref    : (1, S_pad, H)
    #   wh_ref     : (H, H)   hidden half of attn weight, (in, out) layout
    #   we_ref     : (H, H)   encoder half of attn weight, (in, out) layout
    #   b_ref      : (1, H)
    #   v_ref      : (1, H)
    #   mask_ref   : (1, 1, S_pad)
    #   out_ref    : (1, 1, S_pad)
    s_pad = enc_ref.shape[1]

    # S-invariant part, hoisted: hidden projection fused with the bias.
    hb = jnp.dot(hidden_ref[0], wh_ref[...],
                 preferred_element_type=jnp.float32) + b_ref[...]        # (1, H)

    # Main MXU matmul: S folded into the M dimension of a plain 2-D dot.
    e_proj = jnp.dot(enc_ref[0], we_ref[...],
                     preferred_element_type=jnp.float32)                 # (S_pad, H)

    energy = jnp.tanh(e_proj + hb)                                       # (S_pad, H)

    # v-projection (N == 1): VPU multiply + cross-lane reduce instead of a
    # degenerate MXU matmul; relayout to a lane-dense (1, S_pad) row.
    scores = jnp.sum(energy * v_ref[...], axis=-1).reshape(1, s_pad)     # (1, S_pad)

    # masked_fill(mask == 0, -1e10); padded positions also carry mask == 0.
    scores = jnp.where(mask_ref[0] == 0.0, jnp.float32(-1e10), scores)

    # Softmax over the (padded) source axis. (In the degenerate fully-masked
    # row case the padded slots also share the uniform mass.)
    m = jnp.max(scores, axis=-1, keepdims=True)
    e = jnp.exp(scores - m)
    out_ref[0] = e / jnp.sum(e, axis=-1, keepdims=True)


def prepare_attention_params(attn_w, attn_b, v_w):
    """Split/transposes done once, outside the per-call path.

    attn_w: (H, 2H) as nn.Linear(2H, H).weight; attn_b: (H,); v_w: (1, H)."""
    H = attn_w.shape[0]
    wh = jnp.asarray(attn_w[:, :H].T)        # (H, H) (in, out) — hidden half
    we = jnp.asarray(attn_w[:, H:].T)        # (H, H) (in, out) — encoder half
    bias = jnp.asarray(attn_b).reshape(1, H)
    v = jnp.asarray(v_w).reshape(1, H)
    return wh, we, bias, v


def pallas_attention(hidden, encoder_outputs, params, mask, *, lane=128):
    """hidden: (B,H) f32, encoder_outputs: (B,S,H) f32,
    params: output of prepare_attention_params, mask: (B,S) f32 (0 == masked)."""
    wh, we, bias, v = params
    B, S, H = encoder_outputs.shape

    # Pad S to a multiple of 128 so the per-step output block is lane-dense.
    s_pad = max(lane, ((S + lane - 1) // lane) * lane)
    if s_pad != S:
        encoder_outputs = jnp.pad(encoder_outputs,
                                  ((0, 0), (0, s_pad - S), (0, 0)))
        mask = jnp.pad(mask, ((0, 0), (0, s_pad - S)))   # pad = masked out

    hidden3 = hidden.reshape(B, 1, H)
    mask3 = mask.reshape(B, 1, s_pad)

    flops = 2 * B * s_pad * H * H + 2 * B * H * H + 2 * B * s_pad * H
    transcendentals = B * s_pad * H + B * s_pad
    bytes_accessed = 4 * (B * s_pad * H      # encoder block
                          + 2 * H * H + 2 * H  # weights / bias / v
                          + B * H              # hidden
                          + 2 * B * s_pad)     # mask + output

    out = pl.pallas_call(
        _attention_kernel,
        out_shape=jax.ShapeDtypeStruct((B, 1, s_pad), jnp.float32),
        grid_spec=pltpu.PrefetchScalarGridSpec(
            num_scalar_prefetch=0,
            grid=(B,),
            in_specs=[
                pl.BlockSpec((1, 1, H), lambda i: (i, 0, 0)),        # hidden
                pl.BlockSpec((1, s_pad, H), lambda i: (i, 0, 0)),    # enc
                pl.BlockSpec((H, H), lambda i: (0, 0)),              # Wh^T
                pl.BlockSpec((H, H), lambda i: (0, 0)),              # We^T
                pl.BlockSpec((1, H), lambda i: (0, 0)),              # bias
                pl.BlockSpec((1, H), lambda i: (0, 0)),              # v
                pl.BlockSpec((1, 1, s_pad), lambda i: (i, 0, 0)),    # mask
            ],
            out_specs=pl.BlockSpec((1, 1, s_pad), lambda i: (i, 0, 0)),
        ),
        compiler_params=pltpu.CompilerParams(
            dimension_semantics=("parallel",),
            vmem_limit_bytes=32 * 1024 * 1024,
        ),
        cost_estimate=pl.CostEstimate(
            flops=int(flops),
            transcendentals=int(transcendentals),
            bytes_accessed=int(bytes_accessed),
        ),
    )(hidden3, encoder_outputs, wh, we, bias, v, mask3)

    return out.reshape(B, s_pad)[:, :S]


def reference_attention(hidden, encoder_outputs, attn_w, attn_b, v_w, mask):
    B, S, H = encoder_outputs.shape
    h_rep = jnp.repeat(hidden[:, None, :], S, axis=1)            # (B, S, H)
    cat = jnp.concatenate([h_rep, encoder_outputs], axis=2)      # (B, S, 2H)
    energy = jnp.tanh(cat @ attn_w.T + attn_b)                   # (B, S, H)
    attention = (energy @ v_w.T)[..., 0]                         # (B, S)
    attention = jnp.where(mask == 0, -1e10, attention)
    return jax.nn.softmax(attention, axis=1)


if __name__ == "__main__":
    B, S, H = 2, 8, 32

    key = jax.random.PRNGKey(0)
    k_hid, k_enc, k_w, k_b, k_v = jax.random.split(key, 5)

    hidden = jax.random.normal(k_hid, (B, H), dtype=jnp.float32)
    encoder_outputs = jax.random.normal(k_enc, (B, S, H), dtype=jnp.float32)

    # deterministic parameter init (PyTorch-style uniform bounds)
    bound_attn = 1.0 / np.sqrt(2 * H)
    attn_w = jax.random.uniform(k_w, (H, 2 * H), minval=-bound_attn,
                                maxval=bound_attn, dtype=jnp.float32)
    attn_b = jax.random.uniform(k_b, (H,), minval=-bound_attn,
                                maxval=bound_attn, dtype=jnp.float32)
    bound_v = 1.0 / np.sqrt(H)
    v_w = jax.random.uniform(k_v, (1, H), minval=-bound_v,
                             maxval=bound_v, dtype=jnp.float32)

    # mask: 1 = keep, 0 = masked out (last two positions of batch 1 masked)
    mask = np.ones((B, S), dtype=np.float32)
    mask[1, -2:] = 0.0
    mask = jnp.asarray(mask)

    params = prepare_attention_params(attn_w, attn_b, v_w)
    out = pallas_attention(hidden, encoder_outputs, params, mask)
    out = jax.block_until_ready(out)

    ref = reference_attention(hidden, encoder_outputs, attn_w, attn_b, v_w, mask)
    np.testing.assert_allclose(np.asarray(out), np.asarray(ref),
                               rtol=1e-5, atol=1e-5)

    print("KERNEL_OK")
</pallas_src>

<mosaic_0001>
module attributes {stable_mosaic.version = 11 : i64} {
  func.func @_attention_kernel(%arg0: i32, %arg1: memref<1x1x32xf32, #tpu.memory_space<vmem>>, %arg2: memref<1x128x32xf32, #tpu.memory_space<vmem>>, %arg3: memref<32x32xf32, #tpu.memory_space<vmem>>, %arg4: memref<32x32xf32, #tpu.memory_space<vmem>>, %arg5: memref<1x32xf32, #tpu.memory_space<vmem>>, %arg6: memref<1x32xf32, #tpu.memory_space<vmem>>, %arg7: memref<1x1x128xf32, #tpu.memory_space<vmem>>, %arg8: memref<1x1x128xf32, #tpu.memory_space<vmem>>) attributes {dimension_semantics = [#tpu.dimension_semantics<parallel>], iteration_bounds = array<i64: 2>, scalar_prefetch = 0 : i64, scratch_operands = 0 : i64, tpu.core_type = #tpu.core_type<tc>, window_params = [{transform_indices = @transform_0, window_bounds = array<i64: 1, 1, 32>}, {transform_indices = @transform_1, window_bounds = array<i64: 1, 128, 32>}, {pipeline_mode = #tpu.pipeline_mode<synchronous>, transform_indices = @transform_2, window_bounds = array<i64: 32, 32>}, {pipeline_mode = #tpu.pipeline_mode<synchronous>, transform_indices = @transform_3, window_bounds = array<i64: 32, 32>}, {pipeline_mode = #tpu.pipeline_mode<synchronous>, transform_indices = @transform_4, window_bounds = array<i64: 1, 32>}, {pipeline_mode = #tpu.pipeline_mode<synchronous>, transform_indices = @transform_5, window_bounds = array<i64: 1, 32>}, {transform_indices = @transform_6, window_bounds = array<i64: 1, 1, 128>}, {transform_indices = @transform_7, window_bounds = array<i64: 1, 1, 128>}]} {
    %c0 = arith.constant 0 : index
    %c0_0 = arith.constant 0 : index
    %c0_1 = arith.constant 0 : index
    %0 = vector.load %arg1[%c0, %c0_0, %c0_1] : memref<1x1x32xf32, #tpu.memory_space<vmem>>, vector<1x1x32xf32>
    %1 = vector.shape_cast %0 : vector<1x1x32xf32> to vector<1x32xf32>
    %c0_2 = arith.constant 0 : index
    %c0_3 = arith.constant 0 : index
    %2 = vector.load %arg3[%c0_2, %c0_3] : memref<32x32xf32, #tpu.memory_space<vmem>>, vector<32x32xf32>
    %cst = arith.constant dense<0.000000e+00> : vector<1x32xf32>
    %3 = tpu.matmul %1, %2, %cst {dimension_numbers = #tpu.dot_dimension_numbers<[1], [0], [0], [1], [0, 0, 1, 1], [], []>} : vector<1x32xf32>, vector<32x32xf32>, vector<1x32xf32> -> vector<1x32xf32>
    %c0_4 = arith.constant 0 : index
    %c0_5 = arith.constant 0 : index
    %4 = vector.load %arg5[%c0_4, %c0_5] : memref<1x32xf32, #tpu.memory_space<vmem>>, vector<1x32xf32>
    %5 = arith.addf %3, %4 : vector<1x32xf32>
    %c0_6 = arith.constant 0 : index
    %c0_7 = arith.constant 0 : index
    %c0_8 = arith.constant 0 : index
    %6 = vector.load %arg2[%c0_6, %c0_7, %c0_8] : memref<1x128x32xf32, #tpu.memory_space<vmem>>, vector<1x128x32xf32>
    %7 = vector.shape_cast %6 : vector<1x128x32xf32> to vector<128x32xf32>
    %c0_9 = arith.constant 0 : index
    %c0_10 = arith.constant 0 : index
    %8 = vector.load %arg4[%c0_9, %c0_10] : memref<32x32xf32, #tpu.memory_space<vmem>>, vector<32x32xf32>
    %cst_11 = arith.constant dense<0.000000e+00> : vector<128x32xf32>
    %9 = tpu.matmul %7, %8, %cst_11 {dimension_numbers = #tpu.dot_dimension_numbers<[1], [0], [0], [1], [0, 0, 1, 1], [], []>} : vector<128x32xf32>, vector<32x32xf32>, vector<128x32xf32> -> vector<128x32xf32>
    %10 = vector.broadcast %5 : vector<1x32xf32> to vector<128x32xf32>
    %11 = arith.addf %9, %10 : vector<128x32xf32>
    %12 = math.tanh %11 : vector<128x32xf32>
    %c0_12 = arith.constant 0 : index
    %c0_13 = arith.constant 0 : index
    %13 = vector.load %arg6[%c0_12, %c0_13] : memref<1x32xf32, #tpu.memory_space<vmem>>, vector<1x32xf32>
    %14 = vector.broadcast %13 : vector<1x32xf32> to vector<128x32xf32>
    %15 = arith.mulf %12, %14 : vector<128x32xf32>
    %cst_14 = arith.constant dense<0.000000e+00> : vector<128xf32>
    %16 = vector.multi_reduction <add>, %15, %cst_14 [1] : vector<128x32xf32> to vector<128xf32>
    %17 = vector.shape_cast %16 : vector<128xf32> to vector<1x128xf32>
    %c0_15 = arith.constant 0 : index
    %c0_16 = arith.constant 0 : index
    %c0_17 = arith.constant 0 : index
    %18 = vector.load %arg7[%c0_15, %c0_16, %c0_17] : memref<1x1x128xf32, #tpu.memory_space<vmem>>, vector<1x1x128xf32>
    %19 = vector.shape_cast %18 : vector<1x1x128xf32> to vector<1x128xf32>
    %cst_18 = arith.constant 0.000000e+00 : f32
    %20 = vector.broadcast %cst_18 : f32 to vector<1x128xf32>
    %21 = arith.cmpf oeq, %19, %20 : vector<1x128xf32>
    %cst_19 = arith.constant -1.000000e+10 : f32
    %22 = vector.broadcast %cst_19 : f32 to vector<1x128xf32>
    %23 = arith.select %21, %22, %17 : vector<1x128xi1>, vector<1x128xf32>
    %cst_20 = arith.constant dense<0xFF800000> : vector<1xf32>
    %24 = vector.multi_reduction <maximumf>, %23, %cst_20 [1] : vector<1x128xf32> to vector<1xf32>
    %25 = vector.shape_cast %24 : vector<1xf32> to vector<1x1xf32>
    %26 = vector.broadcast %25 : vector<1x1xf32> to vector<1x128xf32>
    %27 = arith.subf %23, %26 : vector<1x128xf32>
    %28 = math.exp %27 : vector<1x128xf32>
    %cst_21 = arith.constant dense<0.000000e+00> : vector<1xf32>
    %29 = vector.multi_reduction <add>, %28, %cst_21 [1] : vector<1x128xf32> to vector<1xf32>
    %30 = vector.shape_cast %29 : vector<1xf32> to vector<1x1xf32>
    %31 = vector.broadcast %30 : vector<1x1xf32> to vector<1x128xf32>
    %32 = arith.divf %28, %31 : vector<1x128xf32>
    %c0_22 = arith.constant 0 : index
    %c0_23 = arith.constant 0 : index
    %c0_24 = arith.constant 0 : index
    %33 = vector.load %arg8[%c0_22, %c0_23, %c0_24] : memref<1x1x128xf32, #tpu.memory_space<vmem>>, vector<1x1x128xf32>
    %34 = vector.shape_cast %33 : vector<1x1x128xf32> to vector<1x128xf32>
    %35 = vector.shape_cast %32 : vector<1x128xf32> to vector<1x1x128xf32>
    tpu.vector_store %arg8[%c0_22, %c0_23, %c0_24], %35 {strides = array<i32>} : memref<1x1x128xf32, #tpu.memory_space<vmem>>, vector<1x1x128xf32>,
    return
  }
  func.func @transform_0(%arg0: i32) -> (i32, i32, i32) {
    %c0_i32 = arith.constant 0 : i32
    %c0_i32_0 = arith.constant 0 : i32
    %c0_i32_1 = arith.constant 0 : i32
    return %arg0, %c0_i32, %c0_i32_0 : i32, i32, i32
  }
  func.func @transform_1(%arg0: i32) -> (i32, i32, i32) {
    %c0_i32 = arith.constant 0 : i32
    %c0_i32_0 = arith.constant 0 : i32
    %c0_i32_1 = arith.constant 0 : i32
    return %arg0, %c0_i32, %c0_i32_0 : i32, i32, i32
  }
  func.func @transform_2(%arg0: i32) -> (i32, i32) {
    %c0_i32 = arith.constant 0 : i32
    %c0_i32_0 = arith.constant 0 : i32
    %c0_i32_1 = arith.constant 0 : i32
    return %c0_i32, %c0_i32_0 : i32, i32
  }
  func.func @transform_3(%arg0: i32) -> (i32, i32) {
    %c0_i32 = arith.constant 0 : i32
    %c0_i32_0 = arith.constant 0 : i32
    %c0_i32_1 = arith.constant 0 : i32
    return %c0_i32, %c0_i32_0 : i32, i32
  }
  func.func @transform_4(%arg0: i32) -> (i32, i32) {
    %c0_i32 = arith.constant 0 : i32
    %c0_i32_0 = arith.constant 0 : i32
    %c0_i32_1 = arith.constant 0 : i32
    return %c0_i32, %c0_i32_0 : i32, i32
  }
  func.func @transform_5(%arg0: i32) -> (i32, i32) {
    %c0_i32 = arith.constant 0 : i32
    %c0_i32_0 = arith.constant 0 : i32
    %c0_i32_1 = arith.constant 0 : i32
    return %c0_i32, %c0_i32_0 : i32, i32
  }
  func.func @transform_6(%arg0: i32) -> (i32, i32, i32) {
    %c0_i32 = arith.constant 0 : i32
    %c0_i32_0 = arith.constant 0 : i32
    %c0_i32_1 = arith.constant 0 : i32
    return %arg0, %c0_i32, %c0_i32_0 : i32, i32, i32
  }
  func.func @transform_7(%arg0: i32) -> (i32, i32, i32) {
    %c0_i32 = arith.constant 0 : i32
    %c0_i32_0 = arith.constant 0 : i32
    %c0_i32_1 = arith.constant 0 : i32
    return %arg0, %c0_i32, %c0_i32_0 : i32, i32, i32
  }
}

</mosaic_0001>

<bundles_post_ra>
// kernel: tpu_custom_call.1
= control target key start
LH: loop header
LB: loop body
LE: loop exit
PB: predicated region body
PF: predicated region fallthrough
CT: control target
= control target key end

     0   :  { %12 = vsyncpa [#allocation3], 0  ;;  %s3114_s0 = inlined_call_operand.vmem [shape: f32[2,1,32], index: 0, kind: input, shape index: {}]   ;;  %s3115_s1 = inlined_call_operand.vmem [shape: f32[2,128,32], index: 1, kind: input, shape index: {}]   ;;  %s3116_s2 = inlined_call_operand.vmem [shape: f32[32,32], index: 2, kind: input, shape index: {}]   ;;  %s3117_s3 = inlined_call_operand.vmem [shape: f32[32,32], index: 3, kind: input, shape index: {}]   ;;  %s3118_s4 = inlined_call_operand.vmem [shape: f32[1,32], index: 4, kind: input, shape index: {}]   ;;  %s3119_s5 = inlined_call_operand.vmem [shape: f32[1,32], index: 5, kind: input, shape index: {}]   ;;  %s3120_s6 = inlined_call_operand.vmem [shape: f32[2,1,128], index: 6, kind: input, shape index: {}]   ;;  %s3121_s7 = inlined_call_operand.hbm [shape: f32[2,1,128], index: 7, kind: output, shape index: {}]  }
   0x1   :  { %14 = vsyncpa [#allocation3 + $0x1], 0  ;;  %s2582_s24 = smov 0   ;;  %s2584_s25 = smov 0  }
   0x2   :  { %s2586_s26 = smov 0   ;;  %s2588_s27 = smov 0  }
   0x3 LB: > { %s2603_s28 = sadd.s32 4294967295, %s2534_s27   ;;  %s2276_s29 = sadd.s32 4294967294, %s2534_s27   ;;  %s2534_s27 = sphi %s2588_s27, %s3127_s27   ;;  %s2530_s26 = sphi %s2586_s26, %s3126_s26   ;;  %s2526_s25 = sphi %s2584_s25, %s3125_s25   ;;  %s2522_s24 = sphi %s2582_s24, %s3124_s24  }
   0x4   : > { %s2607_s30 = sadd.s32 1, %s2534_s27   ;;  %s189_s8 = sadd.s32 1, %s2530_s26 }
   0x5   : > { %s186_s9 = ssub.s32 %s2534_s27, %s2607_s30  ;;  %p199_p0 = scmp.ne.s32.totalorder %s2530_s26, %s2526_s25 }
   0x6   : > { %p187_p1 = scmp.eq.s32.totalorder %s186_s9, 0  ;;  %p200_p2 = scmp.eq.s32.totalorder %s2603_s28, 1 }
   0x7   : > { %p205_p3 = scmp.ne.s32.totalorder %s2526_s25, %s2522_s24  ;;  %p206_p4 = scmp.eq.s32.totalorder %s2276_s29, 1 }
   0x8   : > { %s2618_s10 = scalar_select %p187_p1, %s2530_s26, %s189_s8  }
   0x9   : > { %p2620_p5 = por %p200_p2, %p199_p0  ;;  %p2624_p6 = por %p206_p4, %p205_p3 }
   0xa   : > { %p2279_p7 = scmp.ge.s32.totalorder %s2534_s27, 1  ;;  %p256_p8 = scmp.lt.s32.totalorder %s2534_s27, 3 }
   0xc   : > { %p257_p9 = pnand %p2279_p7, %p256_p8 }
   0xd   : > { %v305_v0 = vld [vmem:[%s3116_s2] sm:$0xff] (!%p257_p9)  ;;  %v306_v1 = vld [vmem:[%s3116_s2 + $0x8] sm:$0xff] (!%p257_p9)  ;;  %v2536_v3 = vmov (!%p257_p9), 0.0|0.0   ;;  %v307_v6 = vld [vmem:[%s3116_s2 + $0x10] sm:$0xff] (!%p257_p9)  ;;  %vm2537_vm0 = vmmov (!%p257_p9), 0   ;;  %v2538_v8 = vmov (!%p257_p9), 0.0   ;;  %v404_v31 = vlaneseq (!%p257_p9) }
   0xe   : > { %260 = sbr.rel (%p257_p9) target bundleno = 955 (0x3bb), region = 48  ;;  %v400_v2 = vld [vmem:[%s3117_s3] sm:$0xff] (!%p257_p9)  ;;  %2372 = vmatprep.subr.bf16.mxu0 (!%p257_p9), %v2536_v3  ;;  %v2373_v4 = vpack.c.bf16 (!%p257_p9), %v306_v1, %v305_v0  ;;  %v401_v5 = vld [vmem:[%s3117_s3 + $0x8] sm:$0xff] (!%p257_p9)  ;;  %v308_v7 = vld [vmem:[%s3116_s2 + $0x18] sm:$0xff] (!%p257_p9)  ;;  %2337 = vmatprep.mubr.msk.f32.mxu0 (!%p257_p9), %vm2537_vm0, %v2538_v8  ;;  %p293_p10 = scmp.lt.s32.totalorder (!%p257_p9), %s2603_s28, 1  ;;  %vm310_vm1 = vcmask (!%p257_p9), 261120  }
   0xf   : > { %v2378_v9 = vpack.c.bf16 (!%p257_p9), %v401_v5, %v400_v2  ;;  %v402_v10 = vld [vmem:[%s3117_s3 + $0x10] sm:$0xff] (!%p257_p9)  ;;  %v403_v11 = vld [vmem:[%s3117_s3 + $0x18] sm:$0xff] (!%p257_p9)  ;;  %v2376_v12 = vpack.c.bf16 (!%p257_p9), %v308_v7, %v307_v6  ;;  %v2702_v32 = vshrl.u32 (!%p257_p9), %v404_v31, 7  ;;  %v309_v33 = vld [vmem:[%s3118_s4] sm:$0x1] (!%p257_p9)  ;;  %vm2061_vm2 = vcmask (!%p257_p9), 130112  }
  0x10   : > { %2374 = vmatpush3.bf16.msra.mxu0 (!%p257_p9), %v2373_v4  ;;  %v2382_v13 = vpack.c.bf16 (!%p257_p9), %v403_v11, %v402_v10  ;;  %v2714_v62 = vld [vmem:[%s3119_s5] ss:$0 sm:$0xff] (!%p257_p9)  ;;  %vm2068_vm3 = vcmask (!%p257_p9), 195712   ;;  %vm2075_vm4 = vcmask (!%p257_p9), 261312   ;;  %vm2082_vm5 = vcmask (!%p257_p9), 326912   ;;  %s2300_s17 = sshll.u32 (!%p257_p9), %s2603_s28, 4 }
  0x11   : > { %2386 = vmatprep.subr.bf16.mxu1 (!%p257_p9), %v2378_v9  ;;  %2375 = vmatprep.subr.bf16.mxu0 (!%p257_p9), %v2536_v3  ;;  %v2708_v34 = vsub.s32 (!%p257_p9), 0, %v2702_v32  ;;  %vm2089_vm6 = vcmask (!%p257_p9), 392512   ;;  %vm2096_vm7 = vcmask (!%p257_p9), 458112   ;;  %vm2103_vm8 = vcmask (!%p257_p9), 523712  }
  0x12   : > { %2388 = vmatpush3.bf16.msra.mxu1 (!%p257_p9), %v2378_v9  ;;  %vm2110_vm9 = vcmask (!%p257_p9), 589312   ;;  %vm2117_vm10 = vcmask (!%p257_p9), 654912   ;;  %vm2124_vm11 = vcmask (!%p257_p9), 720512   ;;  %vm2131_vm12 = vcmask (!%p257_p9), 786112  }
  0x13   : > { %2387 = vmatprep.subr.bf16.mxu1 (!%p257_p9), %v2382_v13  ;;  %vm2138_vm13 = vcmask (!%p257_p9), 851712   ;;  %vm2145_vm14 = vcmask (!%p257_p9), 917312   ;;  %vm2152_vm15 = vcmask (!%p257_p9), 982912   ;;  %vm2159_vm0 = vcmask (!%p257_p9), 1048512  }
  0x14   : > { %2377 = vmatpush3.bf16.msra.mxu0 (!%p257_p9), %v2376_v12 }
  0x15   : > { %s2656_s15 = scalar_select %p293_p10, %s2603_s28, 1  ;;  %2379 = vmatprep.subr.bf16.mxu0 %v2378_v9 }
  0x16   : > { %2389 = vmatpush3.bf16.msra.mxu1 %v2382_v13  ;;  %s2541_s28 = smov [#allocation2]  }
  0x17   : > { %s295_s18 = scalar_lea.vmem %s3114_s0, %s2656_s15  ;;  %s2303_s19 = sshll.u32 %s2656_s15, 7 }
  0x18   : > { %s2666_s22 = scalar_lea.vmem %s3115_s1, %s2303_s19  ;;  %v304_v14 = vld [vmem:[%s295_s18] sm:$0x1]  ;;  %s303_s16 = scalar_lea.vmem %s3120_s6, %s2656_s15 }
  0x19   : > { %v390_v15 = vld [vmem:[%s2666_s22 + $0x30] sm:$0xff]  ;;  %v384_v16 = vld [vmem:[%s2666_s22] sm:$0xff]  ;;  %v391_v17 = vld [vmem:[%s2666_s22 + $0x38] sm:$0xff]  ;;  %2338 = vmatmul.mubr.msk.f32.vlgmr.msra.gmra.mrb[0].mxu0 %vm310_vm1, %v304_v14  ;;  %s291_s15 = sand.u32 1, %s2526_s25   ;;  %s2476_s8 = sshll.u32 %s2541_s28, 4  ;;  %s2477_s8 = int_to_ptr.vmem [resolvable:$false] %s2476_s8 }
  0x1a   : > { %2357 = vmatprep.mubr.msk.f32.mxu1 %vm310_vm1, %v390_v15  ;;  %v392_v18 = vld [vmem:[%s2666_s22 + $0x40] sm:$0xff]  ;;  %2381 = vmatpush3.bf16.msra.mxu0 %v2378_v9  ;;  %v393_v19 = vld [vmem:[%s2666_s22 + $0x48] sm:$0xff]  ;;  %v394_v20 = vld [vmem:[%s2666_s22 + $0x50] sm:$0xff]  ;;  %s292_s18 = scalar_lea.vmem [#allocation2], %s291_s15  ;;  %s2191_s23 = scalar_lea.sflag [#allocation3], %s291_s15 }
  0x1b   : > { %2348 = vmatprep.mubr.msk.f32.mxu0 %vm310_vm1, %v384_v16  ;;  %2358 = vmatmul.mubr.msk.f32.vlgmr.msra.gmra.mrb[0].mxu1 %vm310_vm1, %v391_v17  ;;  %v385_v21 = vld [vmem:[%s2666_s22 + $0x8] sm:$0xff]  ;;  %v386_v22 = vld [vmem:[%s2666_s22 + $0x10] sm:$0xff]  ;;  %v395_v23 = vld [vmem:[%s2666_s22 + $0x58] sm:$0xff]  ;;  %s2203_s19 = sshll.u32 %s292_s18, 4  ;;  %s2478_s9 = scalar_lea.vmem %s2477_s8, 32  ;;  %s3074_s19 = int_to_ptr.vmem [resolvable:$true] %s2203_s19 }
  0x1c   : > { %2383 = vmatprep.subr.bf16.mxu0 %v2382_v13  ;;  %2360 = vmatprep.mubr.msk.f32.mxu1 %vm310_vm1, %v392_v18  ;;  %v396_v24 = vld [vmem:[%s2666_s22 + $0x60] sm:$0xff]  ;;  %v387_v25 = vld [vmem:[%s2666_s22 + $0x18] sm:$0xff]  ;;  %v397_v27 = vld [vmem:[%s2666_s22 + $0x68] sm:$0xff]  ;;  %s2472_s29 = scalar_lea.vmem %s3074_s19, 16  ;;  %p2479_p0 = scmp.lt.s32.totalorder %s3074_s19, %s2477_s8 }
  0x1d   : > { %v388_v26 = vld [vmem:[%s2666_s22 + $0x20] sm:$0xff]  ;;  %v398_v28 = vld [vmem:[%s2666_s22 + $0x70] sm:$0xff]  ;;  %v389_v29 = vld [vmem:[%s2666_s22 + $0x28] sm:$0xff]  ;;  %p2473_p11 = scmp.ne.s32.totalorder %s3074_s19, %s2472_s29  ;;  %p2480_p1 = scmp.lt.s32.totalorder %s2478_s9, %s2472_s29 }
  0x1e   : > { %2385 = vmatpush3.bf16.msra.mxu0 %v2382_v13  ;;  %v399_v30 = vld [vmem:[%s2666_s22 + $0x78] sm:$0xff]  ;;  %s3072_s22 = scalar_lea.hbm %s3121_s7, %s2300_s17 }
  0x1f   : > { %2361 = vmatmul.mubr.msk.f32.gmra.mrb[2].mxu1 %vm310_vm1, %v393_v19  ;;  %p2474_p12 = pnand %p2473_p11, %p2620_p5  ;;  %p2481_p2 = por %p2480_p1, %p2479_p0 }
  0x20   : > { %2363 = vmatprep.mubr.msk.f32.mxu1 %vm310_vm1, %v394_v20 }
  0x21   : > { %2349 = vmatmul.mubr.msk.f32.vlgmr.msra.gmra.mrb[2].mxu0 %vm310_vm1, %v385_v21  ;;  %p2475_p13 = pneg %p2474_p12 }
  0x22   : > { %2351 = vmatprep.mubr.msk.f32.mxu0 %vm310_vm1, %v386_v22 }
  0x23   : > { %2364 = vmatmul.mubr.msk.f32.gmra.mrb[4].mxu1 %vm310_vm1, %v395_v23  ;;  %p2482_p3 = pnand %p2481_p2, %p2475_p13 }
  0x24   : > { %2366 = vmatprep.mubr.msk.f32.mxu1 %vm310_vm1, %v396_v24 }
  0x25   : > { %2352 = vmatmul.mubr.msk.f32.gmra.mrb[4].mxu0 %vm310_vm1, %v387_v25 }
  0x26   : > { %2354 = vmatprep.mubr.msk.f32.mxu0 %vm310_vm1, %v388_v26 }
  0x27   : > { %2367 = vmatmul.mubr.msk.f32.gmra.mrb[6].mxu1 %vm310_vm1, %v397_v27 }
  0x28   : > { %2369 = vmatprep.mubr.msk.f32.mxu1 %vm310_vm1, %v398_v28 }
  0x29   : > { %2355 = vmatmul.mubr.msk.f32.gmra.mrb[6].mxu0 %vm310_vm1, %v389_v29 }
  0x2b   : > { %2370 = vmatmul.mubr.msk.f32.gmra.mrb[8].mxu1 %vm310_vm1, %v399_v30 }
  0xec   : > { %v380_v35 = vpop.f32.mrb[0].mxu0 }
  0xed   : > { %v381_v36 = vadd.f32 %v380_v35, %v309_v33  ;;  %v2339_v37 = vpop.f32.mrb[1].mxu0 }
  0xee   : > { %v2359_v38 = vpop.f32.mrb[0].mxu1 }
  0xef   : > { %v407_v39 = vrot.slane %v381_v36, %v2708_v34  ;;  %v552_v40 = vpop.f32.mrb[1].mxu1 }
  0xf1   : > { %v558_v41 = vadd.f32 %v2359_v38, %v407_v39  ;;  %v553_v42 = vadd.f32 %v552_v40, %v407_v39 }
  0xf2   : > { %v2362_v43 = vpop.f32.mrb[2].mxu1 }
  0xf3   : > { %2436 = vtanh.f32 %v558_v41  ;;  %v568_v44 = vadd.f32 %v2362_v43, %v407_v39  ;;  %v562_v45 = vpop.f32.mrb[3].mxu1 }
  0xf4   : > { %2438 = vtanh.f32 %v553_v42  ;;  %v563_v46 = vadd.f32 %v562_v45, %v407_v39  ;;  %v2350_v47 = vpop.f32.mrb[2].mxu0 }
  0xf5   : > { %2440 = vtanh.f32 %v568_v44  ;;  %v528_v48 = vadd.f32 %v2350_v47, %v407_v39  ;;  %v522_v49 = vpop.f32.mrb[3].mxu0 }
  0xf6   : > { %2442 = vtanh.f32 %v563_v46  ;;  %v523_v50 = vadd.f32 %v522_v49, %v407_v39  ;;  %v2365_v51 = vpop.f32.mrb[4].mxu1 }
  0xf7   : > { %v578_v52 = vadd.f32 %v2365_v51, %v407_v39  ;;  %v572_v53 = vpop.f32.mrb[5].mxu1  ;;  %2444 = vtanh.f32 %v528_v48 }
  0xf8   : > { %v573_v54 = vadd.f32 %v572_v53, %v407_v39  ;;  %v2353_v55 = vpop.f32.mrb[4].mxu0  ;;  %2446 = vtanh.f32 %v523_v50 }
  0xf9   : > { %v538_v56 = vadd.f32 %v2353_v55, %v407_v39  ;;  %v532_v57 = vpop.f32.mrb[5].mxu0  ;;  %v2539_v55 = vmov 0  }
  0xfa   : > { %v533_v58 = vadd.f32 %v532_v57, %v407_v39  ;;  %v2368_v59 = vpop.f32.mrb[6].mxu1  ;;  %2434 = vset.pattern.permute.xlu1 %v2539_v55  ;;  %2435 = vset.pattern.permute.xlu0 %v2539_v55 }
  0xfb   : > { %2448 = vtanh.f32 %v538_v56  ;;  %v588_v60 = vadd.f32 %v2368_v59, %v407_v39  ;;  %v582_v61 = vpop.f32.mrb[7].mxu1 }
  0xfc   : > { %2450 = vtanh.f32 %v533_v58  ;;  %v583_v63 = vadd.f32 %v582_v61, %v407_v39  ;;  %v2356_v0 = vpop.f32.mrb[6].mxu0 }
  0xfd   : > { %v2437_v1 = vpop.eup %2436  ;;  %v548_v2 = vadd.f32 %v2356_v0, %v407_v39  ;;  %v542_v3 = vpop.f32.mrb[7].mxu0  ;;  %v2749_v0 = vsub.s32 1, %v2702_v32 }
  0xfe   : > { %v2439_v4 = vpop.eup %2438  ;;  %v543_v5 = vadd.f32 %v542_v3, %v407_v39  ;;  %v2371_v6 = vpop.f32.mrb[8].mxu1  ;;  %v631_v7 = vmul.f32 %v2437_v1, %v2714_v62  ;;  %v2752_v1 = vsub.s32 2, %v2702_v32  ;;  %v2761_v3 = vsub.s32 5, %v2702_v32 }
  0xff   : > { %v2441_v8 = vpop.eup %2440  ;;  %2452 = vtanh.f32 %v548_v2  ;;  %v598_v9 = vadd.f32 %v2371_v6, %v407_v39  ;;  %v592_v10 = vpop.f32.mrb[9].mxu1  ;;  %v630_v11 = vmul.f32 %v2439_v4, %v2714_v62  ;;  %v2755_v2 = vsub.s32 3, %v2702_v32 }
 0x100   : > { %v2443_v12 = vpop.eup %2442  ;;  %2454 = vtanh.f32 %v543_v5  ;;  %v593_v13 = vadd.f32 %v592_v10, %v407_v39  ;;  %v661_v14 = vsel %vm310_vm1, %v631_v7, 0.0  ;;  %v633_v15 = vmul.f32 %v2441_v8, %v2714_v62 }
 0x101   : > { %662 = vadd.xlane.f32.xlu1 %v661_v14  ;;  %v658_v16 = vsel %vm310_vm1, %v630_v11, 0.0  ;;  %v632_v17 = vmul.f32 %v2443_v12, %v2714_v62  ;;  %v2445_v18 = vpop.eup %2444  ;;  %2456 = vtanh.f32 %v578_v52  ;;  %v2764_v4 = vsub.s32 6, %v2702_v32 }
 0x102   : > { %659 = vadd.xlane.f32.xlu0 %v658_v16  ;;  %v2447_v19 = vpop.eup %2446  ;;  %2458 = vtanh.f32 %v573_v54  ;;  %v667_v20 = vsel %vm310_vm1, %v633_v15, 0.0  ;;  %v625_v23 = vmul.f32 %v2445_v18, %v2714_v62  ;;  %v2767_v5 = vsub.s32 7, %v2702_v32 }
 0x103   : > { %v664_v22 = vsel %vm310_vm1, %v632_v17, 0.0  ;;  %2460 = vtanh.f32 %v588_v60  ;;  %v624_v30 = vmul.f32 %v2447_v19, %v2714_v62  ;;  %v2540_v60 = vmov 1966171168  }
 0x104   : > { %2462 = vtanh.f32 %v583_v63  ;;  %v643_v29 = vsel %vm310_vm1, %v625_v23, 0.0  ;;  %v1223_v61 = vunpack.c.l.s4 %v2540_v60 }
 0x105   : > { %v2449_v21 = vpop.eup %2448  ;;  %668 = vadd.xlane.f32.xlu1 %v667_v20  ;;  %2464 = vtanh.f32 %v598_v9  ;;  %v640_v38 = vsel %vm310_vm1, %v624_v30, 0.0 }
 0x106   : > { %v2451_v24 = vpop.eup %2450  ;;  %665 = vadd.xlane.f32.xlu0 %v664_v22  ;;  %v627_v25 = vmul.f32 %v2449_v21, %v2714_v62  ;;  %2466 = vtanh.f32 %v593_v13  ;;  %v1224_v63 = vunpack.c.0.s8 %v1223_v61 }
 0x107   : > { %v626_v27 = vmul.f32 %v2451_v24, %v2714_v62 }
 0x108   : > { %v649_v26 = vsel %vm310_vm1, %v627_v25, 0.0  ;;  %v2770_v7 = vsub.s32 %v1224_v63, %v2702_v32 }
 0x109   : > { %v2453_v28 = vpop.eup %2452  ;;  %650 = vadd.xlane.f32.xlu1 %v649_v26  ;;  %v646_v35 = vsel %vm310_vm1, %v626_v27, 0.0 }
 0x10a   : > { %v2455_v33 = vpop.eup %2454  ;;  %644 = vadd.xlane.f32.xlu0 %v643_v29  ;;  %v629_v36 = vmul.f32 %v2453_v28, %v2714_v62 }
 0x10b   : > { %v2457_v37 = vpop.eup %2456  ;;  %v628_v39 = vmul.f32 %v2455_v33, %v2714_v62 }
 0x10c   : > { %v2459_v40 = vpop.eup %2458  ;;  %v655_v41 = vsel %vm310_vm1, %v629_v36, 0.0  ;;  %v635_v42 = vmul.f32 %v2457_v37, %v2714_v62 }
 0x10d   : > { %647 = vadd.xlane.f32.xlu1 %v646_v35  ;;  %v2461_v43 = vpop.eup %2460  ;;  %v652_v44 = vsel %vm310_vm1, %v628_v39, 0.0  ;;  %v634_v45 = vmul.f32 %v2459_v40, %v2714_v62 }
 0x10e   : > { %641 = vadd.xlane.f32.xlu0 %v640_v38  ;;  %v2463_v46 = vpop.eup %2462  ;;  %v673_v47 = vsel %vm310_vm1, %v635_v42, 0.0  ;;  %v637_v48 = vmul.f32 %v2461_v43, %v2714_v62 }
 0x10f   : > { %v2465_v49 = vpop.eup %2464  ;;  %v670_v50 = vsel %vm310_vm1, %v634_v45, 0.0  ;;  %v636_v51 = vmul.f32 %v2463_v46, %v2714_v62 }
 0x110   : > { %v2467_v52 = vpop.eup %2466  ;;  %v679_v53 = vsel %vm310_vm1, %v637_v48, 0.0  ;;  %v639_v54 = vmul.f32 %v2465_v49, %v2714_v62 }
 0x111   : > { %656 = vadd.xlane.f32.xlu1 %v655_v41  ;;  %v676_v56 = vsel %vm310_vm1, %v636_v51, 0.0  ;;  %v638_v57 = vmul.f32 %v2467_v52, %v2714_v62  ;;  %v2758_v62 = vsub.s32 4, %v2702_v32 }
 0x112   : > { %653 = vadd.xlane.f32.xlu0 %v652_v44  ;;  %v685_v58 = vsel %vm310_vm1, %v639_v54, 0.0 }
 0x113   : > { %v682_v59 = vsel %vm310_vm1, %v638_v57, 0.0 }
 0x115   : > { %674 = vadd.xlane.f32.xlu1 %v673_v47 }
 0x116   : > { %671 = vadd.xlane.f32.xlu0 %v670_v50 }
 0x119   : > { %680 = vadd.xlane.f32.xlu1 %v679_v53 }
 0x11a   : > { %677 = vadd.xlane.f32.xlu0 %v676_v56 }
 0x11d   : > { %686 = vadd.xlane.f32.xlu1 %v685_v58 }
 0x11e   : > { %683 = vadd.xlane.f32.xlu0 %v682_v59 }
 0x18e   : > { %v663_v6 = vpop.xlane.xlu1 %662 }
 0x18f   : > { %v660_v8 = vpop.xlane.xlu0 %659  ;;  %v933_v9 = vrot.slane %v663_v6, %v2708_v34  ;;  %v937_v10 = vrot.slane %v663_v6, %v2749_v0  ;;  %v941_v11 = vrot.slane %v663_v6, %v2752_v1  ;;  %v945_v12 = vrot.slane %v663_v6, %v2755_v2 }
 0x190   : > { %v901_v13 = vrot.slane %v660_v8, %v2708_v34  ;;  %v905_v14 = vrot.slane %v660_v8, %v2749_v0  ;;  %v909_v15 = vrot.slane %v660_v8, %v2752_v1  ;;  %v913_v16 = vrot.slane %v660_v8, %v2755_v2 }
 0x191   : > { %v917_v17 = vrot.slane %v660_v8, %v2758_v62  ;;  %v921_v18 = vrot.slane %v660_v8, %v2761_v3  ;;  %v925_v19 = vrot.slane %v660_v8, %v2764_v4  ;;  %v929_v20 = vrot.slane %v660_v8, %v2767_v5 }
 0x192   : > { %v1512_v21 = vcombine.low %v901_v13, %v905_v14  ;;  %v1513_v22 = vcombine.low %v909_v15, %v913_v16  ;;  %v949_v23 = vrot.slane %v663_v6, %v2758_v62  ;;  %v953_v24 = vrot.slane %v663_v6, %v2761_v3  ;;  %v2807_v63 = vpop.xlane.xlu1 %668 }
 0x193   : > { %v666_v25 = vpop.xlane.xlu0 %665  ;;  %v1514_v26 = vcombine.low %v917_v17, %v921_v18  ;;  %v1515_v27 = vcombine.low %v925_v19, %v929_v20  ;;  %v957_v28 = vrot.slane %v663_v6, %v2764_v4  ;;  %v961_v29 = vrot.slane %v663_v6, %v2767_v5 }
 0x194   : > { %v1522_v30 = vrot.slane %v1512_v21, %v2770_v7  ;;  %v1529_v33 = vrot.slane %v1513_v22, %v2770_v7  ;;  %v1561_v35 = vcombine.low %v933_v9, %v937_v10  ;;  %v1562_v36 = vcombine.low %v941_v11, %v945_v12 }
 0x195   : > { %v1536_v37 = vrot.slane %v1514_v26, %v2770_v7  ;;  %v1543_v38 = vrot.slane %v1515_v27, %v2770_v7  ;;  %v1563_v39 = vcombine.low %v949_v23, %v953_v24  ;;  %v1564_v40 = vcombine.low %v957_v28, %v961_v29 }
 0x196   : > { %v1544_v41 = vcombine.low %v1522_v30, %v1529_v33  ;;  %v1571_v42 = vrot.slane %v1561_v35, %v2770_v7  ;;  %v1578_v43 = vrot.slane %v1562_v36, %v2770_v7  ;;  %v965_v44 = vrot.slane %v666_v25, %v2708_v34  ;;  %v651_v35 = vpop.xlane.xlu1 %650 }
 0x197   : > { %v645_v45 = vpop.xlane.xlu0 %644  ;;  %v1545_v46 = vcombine.low %v1536_v37, %v1543_v38  ;;  %v1585_v47 = vrot.slane %v1563_v39, %v2770_v7  ;;  %v1592_v48 = vrot.slane %v1564_v40, %v2770_v7  ;;  %v969_v49 = vrot.slane %v666_v25, %v2749_v0 }
 0x198   : > { %v1552_v50 = vrot.slane %v1544_v41, %v2770_v7  ;;  %v1593_v51 = vcombine.low %v1571_v42, %v1578_v43  ;;  %v973_v52 = vrot.slane %v666_v25, %v2752_v1  ;;  %v977_v53 = vrot.slane %v666_v25, %v2755_v2 }
 0x199   : > { %v1559_v54 = vrot.slane %v1545_v46, %v2770_v7  ;;  %v1594_v55 = vcombine.low %v1585_v47, %v1592_v48  ;;  %v981_v56 = vrot.slane %v666_v25, %v2758_v62  ;;  %v985_v57 = vrot.slane %v666_v25, %v2761_v3 }
 0x19a   : > { %v1601_v58 = vrot.slane %v1593_v51, %v2770_v7  ;;  %v989_v59 = vrot.slane %v666_v25, %v2764_v4  ;;  %v993_v60 = vrot.slane %v666_v25, %v2767_v5  ;;  %v1610_v61 = vcombine.low %v965_v44, %v969_v49 }
 0x19b   : > { %v1560_v6 = vcombine.low %v1552_v50, %v1559_v54  ;;  %v1608_v8 = vrot.slane %v1594_v55, %v2770_v7  ;;  %v1611_v9 = vcombine.low %v973_v52, %v977_v53  ;;  %v1612_v10 = vcombine.low %v981_v56, %v985_v57  ;;  %v642_v15 = vpop.xlane.xlu0 %641 }
 0x19c   : > { %v1613_v11 = vcombine.low %v989_v59, %v993_v60  ;;  %v1620_v12 = vrot.slane %v1610_v61, %v2770_v7  ;;  %v741_v13 = vrot.slane %v645_v45, %v2708_v34  ;;  %v745_v14 = vrot.slane %v645_v45, %v2749_v0  ;;  %v2839_v60 = vpop.xlane.xlu1 %647 }
 0x19d   : > { %2021 = vperm.xlu1 %2434, %v1560_v6   ;;  %v1609_v16 = vcombine.low %v1601_v58, %v1608_v8  ;;  %v1627_v17 = vrot.slane %v1611_v9, %v2770_v7  ;;  %v1634_v18 = vrot.slane %v1612_v10, %v2770_v7  ;;  %v749_v19 = vrot.slane %v645_v45, %v2752_v1 }
 0x19e   : > { %v1641_v20 = vrot.slane %v1613_v11, %v2770_v7  ;;  %v753_v21 = vrot.slane %v645_v45, %v2755_v2  ;;  %v757_v22 = vrot.slane %v645_v45, %v2758_v62  ;;  %v761_v23 = vrot.slane %v645_v45, %v2761_v3 }
 0x19f   : > { %v1642_v24 = vcombine.low %v1620_v12, %v1627_v17  ;;  %v765_v25 = vrot.slane %v645_v45, %v2764_v4  ;;  %v769_v26 = vrot.slane %v645_v45, %v2767_v5  ;;  %v1267_v27 = vcombine.low %v741_v13, %v745_v14 }
 0x1a0   : > { %v1643_v28 = vcombine.low %v1634_v18, %v1641_v20  ;;  %v1268_v29 = vcombine.low %v749_v19, %v753_v21  ;;  %v1269_v30 = vcombine.low %v757_v22, %v761_v23  ;;  %v709_v33 = vrot.slane %v642_v15, %v2708_v34 }
 0x1a1   : > { %2024 = vperm.xlu1 %2434, %v1609_v16   ;;  %v1650_v36 = vrot.slane %v1642_v24, %v2770_v7  ;;  %v1270_v37 = vcombine.low %v765_v25, %v769_v26  ;;  %v1277_v38 = vrot.slane %v1267_v27, %v2770_v7  ;;  %v713_v39 = vrot.slane %v642_v15, %v2749_v0 }
 0x1a2   : > { %v1657_v40 = vrot.slane %v1643_v28, %v2770_v7  ;;  %v1284_v41 = vrot.slane %v1268_v29, %v2770_v7  ;;  %v1291_v42 = vrot.slane %v1269_v30, %v2770_v7  ;;  %v717_v43 = vrot.slane %v642_v15, %v2752_v1  ;;  %v2860_v30 = vpop.xlane.xlu1 %656 }
 0x1a3   : > { %v1298_v44 = vrot.slane %v1270_v37, %v2770_v7  ;;  %v721_v45 = vrot.slane %v642_v15, %v2755_v2  ;;  %v725_v46 = vrot.slane %v642_v15, %v2758_v62  ;;  %v729_v47 = vrot.slane %v642_v15, %v2761_v3 }
 0x1a4   : > { %v1658_v48 = vcombine.low %v1650_v36, %v1657_v40  ;;  %v1299_v49 = vcombine.low %v1277_v38, %v1284_v41  ;;  %v733_v50 = vrot.slane %v642_v15, %v2764_v4  ;;  %v737_v51 = vrot.slane %v642_v15, %v2767_v5 }
 0x1a5   : > { %v1300_v52 = vcombine.low %v1291_v42, %v1298_v44  ;;  %v1218_v53 = vcombine.low %v709_v33, %v713_v39  ;;  %v1219_v54 = vcombine.low %v717_v43, %v721_v45  ;;  %v1220_v55 = vcombine.low %v725_v46, %v729_v47 }
 0x1a6   : > { %2027 = vperm.xlu1 %2434, %v1658_v48   ;;  %v1307_v56 = vrot.slane %v1299_v49, %v2770_v7  ;;  %v1221_v57 = vcombine.low %v733_v50, %v737_v51  ;;  %v805_v58 = vrot.slane %v651_v35, %v2708_v34  ;;  %v809_v59 = vrot.slane %v651_v35, %v2749_v0 }
 0x1a7   : > { %v1314_v61 = vrot.slane %v1300_v52, %v2770_v7  ;;  %v1228_v6 = vrot.slane %v1218_v53, %v2770_v7  ;;  %v1235_v8 = vrot.slane %v1219_v54, %v2770_v7  ;;  %v1242_v9 = vrot.slane %v1220_v55, %v2770_v7 }
 0x1a8   : > { %v1249_v10 = vrot.slane %v1221_v57, %v2770_v7  ;;  %v813_v11 = vrot.slane %v651_v35, %v2752_v1  ;;  %v817_v12 = vrot.slane %v651_v35, %v2755_v2  ;;  %v821_v13 = vrot.slane %v651_v35, %v2758_v62  ;;  %v675_v57 = vpop.xlane.xlu1 %674 }
 0x1a9   : > { %v1315_v14 = vcombine.low %v1307_v56, %v1314_v61  ;;  %v1250_v15 = vcombine.low %v1228_v6, %v1235_v8  ;;  %v825_v16 = vrot.slane %v651_v35, %v2761_v3  ;;  %v829_v17 = vrot.slane %v651_v35, %v2764_v4 }
 0x1aa   : > { %v1251_v18 = vcombine.low %v1242_v9, %v1249_v10  ;;  %v833_v19 = vrot.slane %v651_v35, %v2767_v5  ;;  %v1365_v20 = vcombine.low %v805_v58, %v809_v59  ;;  %v1366_v21 = vcombine.low %v813_v11, %v817_v12 }
 0x1ab   : > { %2006 = vperm.xlu1 %2434, %v1315_v14   ;;  %v1258_v22 = vrot.slane %v1250_v15, %v2770_v7  ;;  %v1367_v23 = vcombine.low %v821_v13, %v825_v16  ;;  %v997_v24 = vrot.slane %v2807_v63, %v2708_v34  ;;  %v1001_v25 = vrot.slane %v2807_v63, %v2749_v0 }
 0x1ac   : > { %v1265_v26 = vrot.slane %v1251_v18, %v2770_v7  ;;  %v1368_v27 = vcombine.low %v829_v17, %v833_v19  ;;  %v1375_v28 = vrot.slane %v1365_v20, %v2770_v7  ;;  %v1382_v29 = vrot.slane %v1366_v21, %v2770_v7 }
 0x1ad   : > { %v1389_v33 = vrot.slane %v1367_v23, %v2770_v7  ;;  %v1005_v35 = vrot.slane %v2807_v63, %v2752_v1  ;;  %v1009_v36 = vrot.slane %v2807_v63, %v2755_v2  ;;  %v1013_v37 = vrot.slane %v2807_v63, %v2758_v62 }
 0x1ae   : > { %v1266_v38 = vcombine.low %v1258_v22, %v1265_v26  ;;  %v1396_v39 = vrot.slane %v1368_v27, %v2770_v7  ;;  %v1397_v40 = vcombine.low %v1375_v28, %v1382_v29  ;;  %v1017_v41 = vrot.slane %v2807_v63, %v2761_v3 }
 0x1af   : > { %v1021_v42 = vrot.slane %v2807_v63, %v2764_v4  ;;  %v1025_v43 = vrot.slane %v2807_v63, %v2767_v5  ;;  %v1659_v44 = vcombine.low %v997_v24, %v1001_v25  ;;  %v1660_v45 = vcombine.low %v1005_v35, %v1009_v36 }
 0x1b0   : > { %2003 = vperm.xlu0 %2435, %v1266_v38   ;;  %v1398_v46 = vcombine.low %v1389_v33, %v1396_v39  ;;  %v1405_v47 = vrot.slane %v1397_v40, %v2770_v7  ;;  %v1661_v48 = vcombine.low %v1013_v37, %v1017_v41  ;;  %v773_v49 = vrot.slane %v2839_v60, %v2708_v34 }
 0x1b1   : > { %v1662_v50 = vcombine.low %v1021_v42, %v1025_v43  ;;  %v1669_v51 = vrot.slane %v1659_v44, %v2770_v7  ;;  %v1676_v52 = vrot.slane %v1660_v45, %v2770_v7  ;;  %v777_v53 = vrot.slane %v2839_v60, %v2749_v0  ;;  %v681_v43 = vpop.xlane.xlu1 %680 }
 0x1b2   : > { %v1412_v63 = vrot.slane %v1398_v46, %v2770_v7  ;;  %v1683_v54 = vrot.slane %v1661_v48, %v2770_v7  ;;  %v781_v55 = vrot.slane %v2839_v60, %v2752_v1  ;;  %v785_v56 = vrot.slane %v2839_v60, %v2755_v2 }
 0x1b3   : > { %v1690_v58 = vrot.slane %v1662_v50, %v2770_v7  ;;  %v1691_v59 = vcombine.low %v1669_v51, %v1676_v52  ;;  %v789_v61 = vrot.slane %v2839_v60, %v2758_v62  ;;  %v793_v6 = vrot.slane %v2839_v60, %v2761_v3 }
 0x1b4   : > { %v1413_v8 = vcombine.low %v1405_v47, %v1412_v63  ;;  %v797_v9 = vrot.slane %v2839_v60, %v2764_v4  ;;  %v801_v10 = vrot.slane %v2839_v60, %v2767_v5  ;;  %v1316_v11 = vcombine.low %v773_v49, %v777_v53 }
 0x1b5   : > { %v1692_v12 = vcombine.low %v1683_v54, %v1690_v58  ;;  %v1699_v13 = vrot.slane %v1691_v59, %v2770_v7  ;;  %v1317_v14 = vcombine.low %v781_v55, %v785_v56  ;;  %v1318_v15 = vcombine.low %v789_v61, %v793_v6 }
 0x1b6   : > { %2012 = vperm.xlu1 %2434, %v1413_v8   ;;  %v1319_v16 = vcombine.low %v797_v9, %v801_v10  ;;  %v1326_v17 = vrot.slane %v1316_v11, %v2770_v7  ;;  %v1061_v18 = vrot.slane %v675_v57, %v2708_v34  ;;  %v1065_v19 = vrot.slane %v675_v57, %v2749_v0 }
 0x1b7   : > { %v1706_v20 = vrot.slane %v1692_v12, %v2770_v7  ;;  %v1333_v21 = vrot.slane %v1317_v14, %v2770_v7  ;;  %v1340_v60 = vrot.slane %v1318_v15, %v2770_v7  ;;  %v1069_v22 = vrot.slane %v675_v57, %v2752_v1 }
 0x1b8   : > { %v1347_v23 = vrot.slane %v1319_v16, %v2770_v7  ;;  %v1073_v24 = vrot.slane %v675_v57, %v2755_v2  ;;  %v1077_v25 = vrot.slane %v675_v57, %v2758_v62  ;;  %v1081_v26 = vrot.slane %v675_v57, %v2761_v3 }
 0x1b9   : > { %v1707_v27 = vcombine.low %v1699_v13, %v1706_v20  ;;  %v1348_v28 = vcombine.low %v1326_v17, %v1333_v21  ;;  %v1085_v29 = vrot.slane %v675_v57, %v2764_v4  ;;  %v1089_v33 = vrot.slane %v675_v57, %v2767_v5  ;;  %v687_v13 = vpop.xlane.xlu1 %686 }
 0x1ba   : > { %v1349_v35 = vcombine.low %v1340_v60, %v1347_v23  ;;  %v1757_v36 = vcombine.low %v1061_v18, %v1065_v19  ;;  %v1758_v37 = vcombine.low %v1069_v22, %v1073_v24  ;;  %v1759_v38 = vcombine.low %v1077_v25, %v1081_v26  ;;  %v654_v24 = vpop.xlane.xlu0 %653 }
 0x1bb   : > { %2030 = vperm.xlu0 %2435, %v1707_v27   ;;  %v1356_v39 = vrot.slane %v1348_v28, %v2770_v7  ;;  %v1760_v40 = vcombine.low %v1085_v29, %v1089_v33  ;;  %v869_v41 = vrot.slane %v2860_v30, %v2708_v34  ;;  %v873_v42 = vrot.slane %v2860_v30, %v2749_v0 }
 0x1bc   : > { %v1363_v44 = vrot.slane %v1349_v35, %v2770_v7  ;;  %v1767_v45 = vrot.slane %v1757_v36, %v2770_v7  ;;  %v1774_v46 = vrot.slane %v1758_v37, %v2770_v7  ;;  %v1781_v47 = vrot.slane %v1759_v38, %v2770_v7 }
 0x1bd   : > { %v1788_v48 = vrot.slane %v1760_v40, %v2770_v7  ;;  %v877_v49 = vrot.slane %v2860_v30, %v2752_v1  ;;  %v881_v50 = vrot.slane %v2860_v30, %v2755_v2  ;;  %v885_v51 = vrot.slane %v2860_v30, %v2758_v62 }
 0x1be   : > { %v1364_v52 = vcombine.low %v1356_v39, %v1363_v44  ;;  %v1789_v53 = vcombine.low %v1767_v45, %v1774_v46  ;;  %v889_v63 = vrot.slane %v2860_v30, %v2761_v3  ;;  %v893_v54 = vrot.slane %v2860_v30, %v2764_v4 }
 0x1bf   : > { %v1790_v55 = vcombine.low %v1781_v47, %v1788_v48  ;;  %v897_v56 = vrot.slane %v2860_v30, %v2767_v5  ;;  %v1463_v57 = vcombine.low %v869_v41, %v873_v42  ;;  %v1464_v58 = vcombine.low %v877_v49, %v881_v50 }
 0x1c0   : > { %2009 = vperm.xlu1 %2434, %v1364_v52   ;;  %v1797_v59 = vrot.slane %v1789_v53, %v2770_v7  ;;  %v1465_v61 = vcombine.low %v885_v51, %v889_v63  ;;  %v1125_v6 = vrot.slane %v681_v43, %v2708_v34  ;;  %v1129_v8 = vrot.slane %v681_v43, %v2749_v0  ;;  %v672_v53 = vpop.xlane.xlu0 %671 }
 0x1c1   : > { %v1804_v9 = vrot.slane %v1790_v55, %v2770_v7  ;;  %v1466_v10 = vcombine.low %v893_v54, %v897_v56  ;;  %v1473_v11 = vrot.slane %v1463_v57, %v2770_v7  ;;  %v1480_v12 = vrot.slane %v1464_v58, %v2770_v7 }
 0x1c2   : > { %v1487_v30 = vrot.slane %v1465_v61, %v2770_v7  ;;  %v1133_v14 = vrot.slane %v681_v43, %v2752_v1  ;;  %v1137_v15 = vrot.slane %v681_v43, %v2755_v2  ;;  %v1141_v16 = vrot.slane %v681_v43, %v2758_v62 }
 0x1c3   : > { %v1805_v17 = vcombine.low %v1797_v59, %v1804_v9  ;;  %v1494_v18 = vrot.slane %v1466_v10, %v2770_v7  ;;  %v1495_v19 = vcombine.low %v1473_v11, %v1480_v12  ;;  %v1145_v20 = vrot.slane %v681_v43, %v2761_v3 }
 0x1c4   : > { %v1149_v21 = vrot.slane %v681_v43, %v2764_v4  ;;  %v1153_v60 = vrot.slane %v681_v43, %v2767_v5  ;;  %v1855_v22 = vcombine.low %v1125_v6, %v1129_v8  ;;  %v1856_v23 = vcombine.low %v1133_v14, %v1137_v15 }
 0x1c5   : > { %2036 = vperm.xlu0 %2435, %v1805_v17   ;;  %v1496_v25 = vcombine.low %v1487_v30, %v1494_v18  ;;  %v1503_v26 = vrot.slane %v1495_v19, %v2770_v7  ;;  %v1857_v27 = vcombine.low %v1141_v16, %v1145_v20  ;;  %v1189_v28 = vrot.slane %v687_v13, %v2708_v34 }
 0x1c6   : > { %v1858_v29 = vcombine.low %v1149_v21, %v1153_v60  ;;  %v1865_v33 = vrot.slane %v1855_v22, %v2770_v7  ;;  %v1872_v35 = vrot.slane %v1856_v23, %v2770_v7  ;;  %v1193_v36 = vrot.slane %v687_v13, %v2749_v0  ;;  %v678_v60 = vpop.xlane.xlu0 %677 }
 0x1c7   : > { %v1510_v37 = vrot.slane %v1496_v25, %v2770_v7  ;;  %v1879_v38 = vrot.slane %v1857_v27, %v2770_v7  ;;  %v1197_v39 = vrot.slane %v687_v13, %v2752_v1  ;;  %v1201_v40 = vrot.slane %v687_v13, %v2755_v2 }
 0x1c8   : > { %v1886_v41 = vrot.slane %v1858_v29, %v2770_v7  ;;  %v1887_v42 = vcombine.low %v1865_v33, %v1872_v35  ;;  %v1205_v43 = vrot.slane %v687_v13, %v2758_v62  ;;  %v1209_v44 = vrot.slane %v687_v13, %v2761_v3 }
 0x1c9   : > { %v1511_v45 = vcombine.low %v1503_v26, %v1510_v37  ;;  %v1213_v46 = vrot.slane %v687_v13, %v2764_v4  ;;  %v1217_v47 = vrot.slane %v687_v13, %v2767_v5  ;;  %v1953_v48 = vcombine.low %v1189_v28, %v1193_v36 }
 0x1ca   : > { %v1888_v49 = vcombine.low %v1879_v38, %v1886_v41  ;;  %v1895_v50 = vrot.slane %v1887_v42, %v2770_v7  ;;  %v1954_v51 = vcombine.low %v1197_v39, %v1201_v40  ;;  %v1955_v52 = vcombine.low %v1205_v43, %v1209_v44 }
 0x1cb   : > { %2018 = vperm.xlu1 %2434, %v1511_v45   ;;  %v1956_v63 = vcombine.low %v1213_v46, %v1217_v47  ;;  %v1963_v54 = vrot.slane %v1953_v48, %v2770_v7  ;;  %v837_v55 = vrot.slane %v654_v24, %v2708_v34  ;;  %v841_v56 = vrot.slane %v654_v24, %v2749_v0 }
 0x1cc   : > { %v1902_v57 = vrot.slane %v1888_v49, %v2770_v7  ;;  %v1970_v58 = vrot.slane %v1954_v51, %v2770_v7  ;;  %v1977_v59 = vrot.slane %v1955_v52, %v2770_v7  ;;  %v845_v61 = vrot.slane %v654_v24, %v2752_v1 }
 0x1cd   : > { %v1984_v6 = vrot.slane %v1956_v63, %v2770_v7  ;;  %v849_v8 = vrot.slane %v654_v24, %v2755_v2  ;;  %v853_v9 = vrot.slane %v654_v24, %v2758_v62  ;;  %v857_v10 = vrot.slane %v654_v24, %v2761_v3 }
 0x1ce   : > { %v1903_v11 = vcombine.low %v1895_v50, %v1902_v57  ;;  %v1985_v12 = vcombine.low %v1963_v54, %v1970_v58  ;;  %v861_v13 = vrot.slane %v654_v24, %v2764_v4  ;;  %v865_v30 = vrot.slane %v654_v24, %v2767_v5  ;;  %v684_v50 = vpop.xlane.xlu0 %683 }
 0x1cf   : > { %v1986_v14 = vcombine.low %v1977_v59, %v1984_v6  ;;  %v1414_v15 = vcombine.low %v837_v55, %v841_v56  ;;  %v1415_v16 = vcombine.low %v845_v61, %v849_v8  ;;  %v1416_v17 = vcombine.low %v853_v9, %v857_v10 }
 0x1d0   : > { %2042 = vperm.xlu0 %2435, %v1903_v11   ;;  %v1993_v18 = vrot.slane %v1985_v12, %v2770_v7  ;;  %v1417_v19 = vcombine.low %v861_v13, %v865_v30  ;;  %v1029_v20 = vrot.slane %v672_v53, %v2708_v34  ;;  %v1033_v21 = vrot.slane %v672_v53, %v2749_v0 }
 0x1d1   : > { %v2000_v22 = vrot.slane %v1986_v14, %v2770_v7  ;;  %v1424_v23 = vrot.slane %v1414_v15, %v2770_v7  ;;  %v1431_v25 = vrot.slane %v1415_v16, %v2770_v7  ;;  %v1438_v24 = vrot.slane %v1416_v17, %v2770_v7 }
 0x1d2   : > { %v1445_v26 = vrot.slane %v1417_v19, %v2770_v7  ;;  %v1037_v27 = vrot.slane %v672_v53, %v2752_v1  ;;  %v1041_v28 = vrot.slane %v672_v53, %v2755_v2  ;;  %v1045_v29 = vrot.slane %v672_v53, %v2758_v62 }
 0x1d3   : > { %v2001_v33 = vcombine.low %v1993_v18, %v2000_v22  ;;  %v1446_v35 = vcombine.low %v1424_v23, %v1431_v25  ;;  %v1049_v36 = vrot.slane %v672_v53, %v2761_v3  ;;  %v1053_v37 = vrot.slane %v672_v53, %v2764_v4 }
 0x1d4   : > { %v1447_v38 = vcombine.low %v1438_v24, %v1445_v26  ;;  %v1057_v39 = vrot.slane %v672_v53, %v2767_v5  ;;  %v1708_v40 = vcombine.low %v1029_v20, %v1033_v21  ;;  %v1709_v41 = vcombine.low %v1037_v27, %v1041_v28 }
 0x1d5   : > { %2048 = vperm.xlu0 %2435, %v2001_v33   ;;  %v1454_v42 = vrot.slane %v1446_v35, %v2770_v7  ;;  %v1710_v43 = vcombine.low %v1045_v29, %v1049_v36  ;;  %v1093_v44 = vrot.slane %v678_v60, %v2708_v34  ;;  %v1097_v45 = vrot.slane %v678_v60, %v2749_v0 }
 0x1d6   : > { %v1461_v46 = vrot.slane %v1447_v38, %v2770_v7  ;;  %v1711_v47 = vcombine.low %v1053_v37, %v1057_v39  ;;  %v1718_v48 = vrot.slane %v1708_v40, %v2770_v7  ;;  %v1725_v49 = vrot.slane %v1709_v41, %v2770_v7 }
 0x1d7   : > { %v1732_v51 = vrot.slane %v1710_v43, %v2770_v7  ;;  %v1101_v52 = vrot.slane %v678_v60, %v2752_v1  ;;  %v1105_v53 = vrot.slane %v678_v60, %v2755_v2  ;;  %v1109_v63 = vrot.slane %v678_v60, %v2758_v62 }
 0x1d8   : > { %v1462_v54 = vcombine.low %v1454_v42, %v1461_v46  ;;  %v1739_v55 = vrot.slane %v1711_v47, %v2770_v7  ;;  %v1740_v56 = vcombine.low %v1718_v48, %v1725_v49  ;;  %v1113_v57 = vrot.slane %v678_v60, %v2761_v3 }
 0x1d9   : > { %v1117_v58 = vrot.slane %v678_v60, %v2764_v4  ;;  %v1121_v59 = vrot.slane %v678_v60, %v2767_v5  ;;  %v1806_v61 = vcombine.low %v1093_v44, %v1097_v45  ;;  %v1807_v6 = vcombine.low %v1101_v52, %v1105_v53 }
 0x1da   : > { %2015 = vperm.xlu1 %2434, %v1462_v54   ;;  %v1741_v8 = vcombine.low %v1732_v51, %v1739_v55  ;;  %v1748_v9 = vrot.slane %v1740_v56, %v2770_v7  ;;  %v1808_v10 = vcombine.low %v1109_v63, %v1113_v57  ;;  %v1157_v11 = vrot.slane %v684_v50, %v2708_v34 }
 0x1db   : > { %v1809_v12 = vcombine.low %v1117_v58, %v1121_v59  ;;  %v1816_v13 = vrot.slane %v1806_v61, %v2770_v7  ;;  %v1823_v30 = vrot.slane %v1807_v6, %v2770_v7  ;;  %v1161_v14 = vrot.slane %v684_v50, %v2749_v0 }
 0x1dc   : > { %v1755_v15 = vrot.slane %v1741_v8, %v2770_v7  ;;  %v1830_v16 = vrot.slane %v1808_v10, %v2770_v7  ;;  %v1165_v17 = vrot.slane %v684_v50, %v2752_v1  ;;  %v1169_v18 = vrot.slane %v684_v50, %v2755_v2 }
 0x1dd   : > { %v1837_v19 = vrot.slane %v1809_v12, %v2770_v7  ;;  %v1838_v20 = vcombine.low %v1816_v13, %v1823_v30  ;;  %v1173_v34 = vrot.slane %v684_v50, %v2758_v62  ;;  %v1177_v21 = vrot.slane %v684_v50, %v2761_v3 }
 0x1de   : > { %v1756_v60 = vcombine.low %v1748_v9, %v1755_v15  ;;  %v1181_v22 = vrot.slane %v684_v50, %v2764_v4  ;;  %v1185_v0 = vrot.slane %v684_v50, %v2767_v5  ;;  %v1904_v23 = vcombine.low %v1157_v11, %v1161_v14 }
 0x1df   : > { %v1839_v25 = vcombine.low %v1830_v16, %v1837_v19  ;;  %v1846_v24 = vrot.slane %v1838_v20, %v2770_v7  ;;  %v1905_v26 = vcombine.low %v1165_v17, %v1169_v18  ;;  %v1906_v1 = vcombine.low %v1173_v34, %v1177_v21 }
 0x1e0   : > { %2033 = vperm.xlu1 %2434, %v1756_v60   ;;  %v1907_v2 = vcombine.low %v1181_v22, %v1185_v0  ;;  %v1914_v27 = vrot.slane %v1904_v23, %v2770_v7  ;;  %v3027_v43 = vand.u32 127, %v404_v31 }
 0x1e1   : > { %v1853_v28 = vrot.slane %v1839_v25, %v2770_v7  ;;  %v1921_v62 = vrot.slane %v1905_v26, %v2770_v7  ;;  %v1928_v3 = vrot.slane %v1906_v1, %v2770_v7 }
 0x1e2   : > { %v1935_v4 = vrot.slane %v1907_v2, %v2770_v7  ;;  %v2056_v44 = vadd.s32 4294967288, %v3027_v43  ;;  %v2063_v45 = vadd.s32 4294967280, %v3027_v43  ;;  %v2054_v48 = vsub.s32 %v3027_v43, %v2702_v32 }
 0x1e3   : > { %v1854_v29 = vcombine.low %v1846_v24, %v1853_v28  ;;  %v1936_v5 = vcombine.low %v1914_v27, %v1921_v62  ;;  %v2070_v51 = vadd.s32 4294967272, %v3027_v43  ;;  %v2077_v52 = vadd.s32 4294967264, %v3027_v43 }
 0x1e4   : > { %v1937_v33 = vcombine.low %v1928_v3, %v1935_v4  ;;  %v2059_v47 = vsub.s32 %v2056_v44, %v2702_v32  ;;  %v2066_v50 = vsub.s32 %v2063_v45, %v2702_v32  ;;  %v2084_v63 = vadd.s32 4294967256, %v3027_v43 }
 0x1e5   : > { %2039 = vperm.xlu1 %2434, %v1854_v29   ;;  %v1944_v35 = vrot.slane %v1936_v5, %v2770_v7  ;;  %v2091_v55 = vadd.s32 4294967248, %v3027_v43  ;;  %v2098_v57 = vadd.s32 4294967240, %v3027_v43  ;;  %v2073_v58 = vsub.s32 %v2070_v51, %v2702_v32 }
 0x1e6   : > { %v1951_v36 = vrot.slane %v1937_v33, %v2770_v7  ;;  %v2105_v59 = vadd.s32 4294967232, %v3027_v43  ;;  %v2080_v6 = vsub.s32 %v2077_v52, %v2702_v32  ;;  %v2112_v9 = vadd.s32 4294967224, %v3027_v43 }
 0x1e7   : > { %v2087_v10 = vsub.s32 %v2084_v63, %v2702_v32  ;;  %v2094_v11 = vsub.s32 %v2091_v55, %v2702_v32  ;;  %v2119_v13 = vadd.s32 4294967216, %v3027_v43  ;;  %v2101_v30 = vsub.s32 %v2098_v57, %v2702_v32 }
 0x1e8   : > { %v1952_v37 = vcombine.low %v1944_v35, %v1951_v36  ;;  %v2108_v16 = vsub.s32 %v2105_v59, %v2702_v32  ;;  %v2126_v17 = vadd.s32 4294967208, %v3027_v43  ;;  %v2115_v19 = vsub.s32 %v2112_v9, %v2702_v32 }
 0x1e9   : > { %v2122_v0 = vsub.s32 %v2119_v13, %v2702_v32  ;;  %v2133_v24 = vadd.s32 4294967200, %v3027_v43  ;;  %v2140_v29 = vadd.s32 4294967192, %v3027_v43 }
 0x1ea   : > { %2045 = vperm.xlu1 %2434, %v1952_v37   ;;  %v2129_v27 = vsub.s32 %v2126_v17, %v2702_v32  ;;  %v2147_v37 = vadd.s32 4294967184, %v3027_v43 }
 0x1eb   : > { %v2136_v33 = vsub.s32 %v2133_v24, %v2702_v32 }
 0x1ec   : > { %v2150_v45 = vsub.s32 %v2147_v37, %v2702_v32 }
 0x21c   : > { %v2022_v38 = vpop.permute.xlu1 %2021 }
 0x21d   : > { %v2095_v21 = vrot.slane %v2022_v38, %v2094_v11 }
 0x220   : > { %v2025_v39 = vpop.permute.xlu1 %2024 }
 0x221   : > { %v2102_v23 = vrot.slane %v2025_v39, %v2101_v30  ;;  %v2154_v39 = vadd.s32 4294967176, %v3027_v43 }
 0x225   : > { %v2028_v40 = vpop.permute.xlu1 %2027 }
 0x226   : > { %v2109_v26 = vrot.slane %v2028_v40, %v2108_v16 }
 0x22a   : > { %v2007_v41 = vpop.permute.xlu1 %2006 }
 0x22b   : > { %v2060_v53 = vrot.slane %v2007_v41, %v2059_v47  ;;  %v2143_v41 = vsub.s32 %v2140_v29, %v2702_v32 }
 0x22f   : > { %v2004_v49 = vpop.permute.xlu0 %2003 }
 0x230   : > { %v2055_v31 = vrot.slane %v2004_v49, %v2054_v48 }
 0x232   : > { %v2062_v8 = vsel %vm2061_vm2, %v2060_v53, %v2055_v31  ;;  %v688_v31 = vld [vmem:[%s303_s16] sm:$0x1]  ;;  %vm2177_vm2 = vcmask 1040384  }
 0x233   : > { %vm689_vm1 = vcmp.eq.f32.partialorder %v688_v31, 0.0 }
 0x235   : > { %v2013_v42 = vpop.permute.xlu1 %2012 }
 0x236   : > { %v2074_v14 = vrot.slane %v2013_v42, %v2073_v58 }
 0x23a   : > { %v2031_v61 = vpop.permute.xlu0 %2030 }
 0x23b   : > { %v2116_v2 = vrot.slane %v2031_v61, %v2115_v19 }
 0x23f   : > { %v2010_v46 = vpop.permute.xlu1 %2009 }
 0x240   : > { %v2067_v56 = vrot.slane %v2010_v46, %v2066_v50  ;;  %v2157_v46 = vsub.s32 %v2154_v39, %v2702_v32 }
 0x242   : > { %v2069_v12 = vsel %vm2068_vm3, %v2067_v56, %v2062_v8 }
 0x243   : > { %v2076_v34 = vsel %vm2075_vm4, %v2074_v14, %v2069_v12 }
 0x244   : > { %v2037_v60 = vpop.permute.xlu0 %2036 }
 0x245   : > { %v2130_v38 = vrot.slane %v2037_v60, %v2129_v27 }
 0x24a   : > { %v2019_v54 = vpop.permute.xlu1 %2018 }
 0x24b   : > { %v2088_v20 = vrot.slane %v2019_v54, %v2087_v10 }
 0x24f   : > { %v2043_v35 = vpop.permute.xlu0 %2042 }
 0x250   : > { %v2144_v49 = vrot.slane %v2043_v35, %v2143_v41 }
 0x254   : > { %v2049_v47 = vpop.permute.xlu0 %2048 }
 0x255   : > { %v2158_v51 = vrot.slane %v2049_v47, %v2157_v46 }
 0x259   : > { %v2016_v15 = vpop.permute.xlu1 %2015 }
 0x25a   : > { %v2081_v18 = vrot.slane %v2016_v15, %v2080_v6 }
 0x25c   : > { %v2083_v22 = vsel %vm2082_vm5, %v2081_v18, %v2076_v34 }
 0x25d   : > { %v2090_v25 = vsel %vm2089_vm6, %v2088_v20, %v2083_v22 }
 0x25e   : > { %v2097_v1 = vsel %vm2096_vm7, %v2095_v21, %v2090_v25 }
 0x25f   : > { %v2034_v28 = vpop.permute.xlu1 %2033  ;;  %v2104_v62 = vsel %vm2103_vm8, %v2102_v23, %v2097_v1 }
 0x260   : > { %v2111_v3 = vsel %vm2110_vm9, %v2109_v26, %v2104_v62  ;;  %v2123_v4 = vrot.slane %v2034_v28, %v2122_v0 }
 0x261   : > { %v2118_v5 = vsel %vm2117_vm10, %v2116_v2, %v2111_v3 }
 0x262   : > { %v2125_v36 = vsel %vm2124_vm11, %v2123_v4, %v2118_v5 }
 0x263   : > { %v2132_v42 = vsel %vm2131_vm12, %v2130_v38, %v2125_v36 }
 0x264   : > { %v2040_v40 = vpop.permute.xlu1 %2039 }
 0x265   : > { %v2137_v44 = vrot.slane %v2040_v40, %v2136_v33 }
 0x267   : > { %v2139_v48 = vsel %vm2138_vm13, %v2137_v44, %v2132_v42 }
 0x268   : > { %v2146_v52 = vsel %vm2145_vm14, %v2144_v49, %v2139_v48 }
 0x269   : > { %v2046_v50 = vpop.permute.xlu1 %2045 }
 0x26a   : > { %v2151_v43 = vrot.slane %v2046_v50, %v2150_v45 }
 0x26c   : > { %v2153_v53 = vsel %vm2152_vm15, %v2151_v43, %v2146_v52 }
 0x26d   : > { %v2160_v63 = vsel %vm2159_vm0, %v2158_v51, %v2153_v53 }
 0x26e   : > { %v2167_v54 = vrot.slane %v2160_v63, %v2770_v7 }
 0x270   : > { %v2174_v32 = vrot.slane %v2167_v54, %v2770_v7 }
 0x272   : > { %v2176_v55 = vsel %vm689_vm1, -1e+10, %v2174_v32 }
 0x273   : > { %v2178_v56 = vsel %vm2177_vm2, %v2176_v55, -inf }
 0x274   : > { %2179 = vmax.xlane.f32.xlu1 %v2178_v56 }
 0x301   : > { %v2180_v57 = vpop.xlane.xlu1 %2179 }
 0x302   : > { %v2181_v58 = vsub.f32 %v2176_v55, %v2180_v57 }
 0x304   : > { %v2182_v59 = vmul.f32 1.442695, %v2181_v58 }
 0x306   : > { %2468 = vpow2.f32 %v2182_v59 }
 0x310   : > { %v2469_v61 = vpop.eup %2468 }
 0x311   : > { %v2184_v6 = vsel %vm2177_vm2, %v2469_v61, 0.0 }
 0x312   : > { %2185 = vadd.xlane.f32.xlu0 %v2184_v6 }
 0x39f   : > { %v2186_v8 = vpop.xlane.xlu0 %2185 }
 0x3a0   : > { %2470 = vrcp.f32 %v2186_v8 }
 0x3aa   : > { %v2471_v9 = vpop.eup %2470 }
 0x3ab   : > { %v2188_v7 = vmul.f32 %v2471_v9, %v2469_v61 }
 0x3ad   : > { %2189 = vst [vmem:[%s292_s18] sm:$0x1] %v2188_v7 }
 0x3ae   : > { %2485 = shalt.err (!%p2482_p3)
}
 0x3af   : > { %s2486_s13 = scalar_lea.hbm %s3072_s22, 16  ;;  %s2490_s15 = scalar_lea.hbm %s3121_s7, 32 }
 0x3b0   : > { %p2487_p4 = scmp.ne.s32.totalorder %s3072_s22, %s2486_s13  ;;  %p2491_p9 = scmp.lt.u32.totalorder %s3072_s22, %s3121_s7 }
 0x3b1   : > { %p2492_p10 = scmp.lt.u32.totalorder %s2490_s15, %s2486_s13  ;;  %p2494_p12 = scmp.lt.u32.totalorder %s2486_s13, %s3072_s22 }
 0x3b2   : > { %p2488_p7 = pnand %p2487_p4, %p2620_p5 }
 0x3b3   : > { %p2493_p11 = por %p2492_p10, %p2491_p9 }
 0x3b4   : > { %p2489_p8 = pneg %p2488_p7 }
 0x3b5   : > { %p2495_p13 = por %p2494_p12, %p2493_p11 }
 0x3b7   : > { %p2496_p0 = pnand %p2495_p13, %p2489_p8 }
 0x3b9   : > { %2499 = shalt.err (!%p2496_p0)
}
 0x3ba   : > { %2390 = dma.vmem_to_hbm [thread:$0]  (%p2620_p5), %s3074_s19, 16, %s3072_s22, %s2191_s23  }
 0x3bb PF: > { %p2396_p1 = scmp.ge.s32.totalorder %s2534_s27, 2  ;;  %s2215_s20 = sand.u32 1, %s2522_s24  }
 0x3bc   : > { %s2216_s21 = scalar_lea.sflag [#allocation3], %s2215_s20 }
 0x3bd   : > { %p2393_p2 = pnand %p2396_p1, %p2624_p6 }
 0x3bf   : > { %2517 = dma.done.wait (!%p2393_p2), %s2216_s21, 16  }
 0x3c0   : > { %2519 = vsyncadd (!%p2393_p2), %s2216_s21, 4294967280  ;;  %p17_p3 = scmp.ge.s32.totalorder %s2607_s30, 4   ;;  %s3124_s24 = smov %s2526_s25 }
 0x3c1   : > { %s3125_s25 = smov %s2530_s26  ;;  %s3126_s26 = smov %s2618_s10 }
 0x3c2   : > { %s3127_s27 = smov %s2607_s30  ;;  %19 = sbr.rel (!%p17_p3) target bundleno = 3 (0x3), region = 89 }
 0x3c9   :  { %2220 = vsyncpa [#allocation3], 1 }
 0x3ca   :  { %2222 = vsyncpa [#allocation3 + $0x1], 1 }

</bundles_post_ra>
